<compile_context>
chip_gen: v5e
topology: v5e:2x2
jax: 0.10.0
libtpu: 0.0.40
codegen_flags: <defaults>
</compile_context>

<pallas_src>
import functools

import jax
import jax.numpy as jnp
from jax import lax
from jax.experimental import pallas as pl
from jax.experimental.pallas import tpu as pltpu

LANES = 128
MAX_TILE_ROWS = 8192   # 4 MiB f32 per input block
CHUNK_ROWS = 512       # in-block compute chunk (bounds live vector values)


def _round_up(x, m):
    return ((x + m - 1) // m) * m


def _num_tensorcores():
    # v7x has 2 TensorCores per chip (megacore-style grid sharding); v5e/v6e
    # have a single TensorCore, where a 2-way split would only add a
    # duplicated clamped tail block.
    # TODO(synk): verify with xprof that the leading "parallel" axis actually
    # lands one half of the grid on each v7x TensorCore; otherwise switch to
    # pltpu.CORE_PARALLEL / pl.core_map.
    try:
        kind = (jax.devices()[0].device_kind or "").lower()
    except Exception:
        return 1
    return 2 if "v7" in kind else 1


def _focal_loss_kernel(p_ref, t_ref, out_ref, acc_ref, *, gamma, alpha,
                       inner_blocks, last_block, last_block_rows,
                       chunk_rows, num_chunks):
    c = pl.program_id(0)          # core (outer "parallel") index
    i = pl.program_id(1)          # sequential block index within the core
    nominal = c * inner_blocks + i
    tile_rows = p_ref.shape[0]

    @pl.when(i == 0)
    def _init():
        acc_ref[...] = jnp.zeros_like(acc_ref)

    def chunk_loss(r0):
        x = p_ref[pl.ds(r0, chunk_rows), :].astype(jnp.float32)
        t = t_ref[pl.ds(r0, chunk_rows), :].astype(jnp.float32)

        # Stable log-sigmoid: log(pt) = min(x,0) - log1p(exp(-|x|));
        #                     log(1-pt) = log(pt) - x.
        e = jnp.exp(-jnp.abs(x))
        log_pt = jnp.minimum(x, 0.0) - jnp.log1p(e)
        log_one_minus_pt = log_pt - x

        # gamma / alpha are compile-time Python constants.
        if gamma == 0.0:
            mod_pos = jnp.float32(1.0)
            mod_neg = jnp.float32(1.0)
        elif gamma == 1.0:
            # sigmoid and 1-sigmoid from e without a third transcendental.
            r = pl.reciprocal(1.0 + e, approx=False)
            pos = x >= 0.0
            pt = jnp.where(pos, r, e * r)
            mod_pos = jnp.where(pos, e * r, r)      # 1 - pt
            mod_neg = pt
        else:
            mod_pos = jnp.exp(gamma * log_one_minus_pt)   # (1-pt)**gamma
            mod_neg = jnp.exp(gamma * log_pt)             # pt**gamma

        return ((-alpha) * mod_pos * t * log_pt
                - (1.0 - alpha) * mod_neg * (1.0 - t) * log_one_minus_pt)

    def run_chunks(n_chunks, masked):
        def body(j, carry):
            r0 = pl.multiple_of(j * chunk_rows, chunk_rows)
            loss = chunk_loss(r0)
            if masked:
                # Block-local row index vs valid-row count: select (not mul)
                # so NaN/Inf from garbage rows cannot leak into the sum.
                row = r0 + lax.broadcasted_iota(jnp.int32, loss.shape, 0)
                loss = jnp.where(row < last_block_rows, loss, 0.0)
            # Leading-axis sum -> one (8, 128) vreg partial (pure VPU adds).
            return carry + loss.reshape(chunk_rows // 8, 8, LANES).sum(axis=0)

        part = lax.fori_loop(0, n_chunks, body,
                             jnp.zeros((8, LANES), jnp.float32))
        acc_ref[...] += part

    if last_block_rows == tile_rows:
        # No ragged rows anywhere: every in-range block is fully valid.
        @pl.when(nominal <= last_block)
        def _full():
            run_chunks(num_chunks, masked=False)
    else:
        @pl.when(nominal < last_block)
        def _interior():                 # hot path: no masking at all
            run_chunks(num_chunks, masked=False)

        @pl.when(nominal == last_block)
        def _boundary():                 # single ragged block; skip dead chunks
            run_chunks(pl.cdiv(last_block_rows, chunk_rows), masked=True)

    # Blocks with nominal > last_block (clamped tail of the 2nd core) skip all
    # compute; their clamped DMA re-read contributes nothing.

    @pl.when(i == pl.num_programs(1) - 1)
    def _finalize():
        out_ref[0, 0] = jnp.sum(acc_ref[...])


def _tail_loss_sum(x, t, gamma, alpha):
    # Plain-JAX (numerically stable) path for the <128-element remainder.
    x = x.astype(jnp.float32)
    t = t.astype(jnp.float32)
    log_pt = jax.nn.log_sigmoid(x)
    log_one_minus_pt = jax.nn.log_sigmoid(-x)
    pt = jnp.exp(log_pt)
    loss = (-alpha * (1.0 - pt) ** gamma * t * log_pt
            - (1.0 - alpha) * pt ** gamma * (1.0 - t) * log_one_minus_pt)
    return jnp.sum(loss)


def bce_focal_loss(predict, target, gamma=1.0, alpha=0.75, reduction="mean"):
    assert predict.shape == target.shape
    if reduction not in ("mean", "sum"):
        # TODO(synk): reduction='none' (elementwise output) not implemented;
        # the module default is 'mean'.
        raise NotImplementedError("only 'mean' and 'sum' reductions implemented")

    n_valid = predict.size
    p_flat = predict.reshape(-1)
    t_flat = target.reshape(-1)

    rows = n_valid // LANES          # full 128-lane rows handled by the kernel
    n_main = rows * LANES
    rem = n_valid - n_main           # <128-element remainder -> plain JAX

    total = jnp.float32(0.0)

    if rows > 0:
        if rem:
            # TODO(synk): this slice still copies the main portion once in the
            # ragged case; a fully copy-free ragged path would need a manual
            # DMA kernel. Zero-copy when numel % 128 == 0 (the common case).
            p_main = lax.slice(p_flat, (0,), (n_main,))
            t_main = lax.slice(t_flat, (0,), (n_main,))
        else:
            p_main, t_main = p_flat, t_flat

        p2d = p_main.reshape(rows, LANES)
        t2d = t_main.reshape(rows, LANES)

        # Tile rows: multiple of 32 (covers f32/bf16/int8 min tiles) and of the
        # chunk size so in-block chunking never indexes past the block.
        if rows <= CHUNK_ROWS:
            tile_rows = _round_up(rows, 32)
            chunk_rows = tile_rows
        else:
            tile_rows = min(MAX_TILE_ROWS, _round_up(rows, CHUNK_ROWS))
            chunk_rows = CHUNK_ROWS
        num_chunks = tile_rows // chunk_rows

        total_blocks = pl.cdiv(rows, tile_rows)
        ncores = _num_tensorcores() if total_blocks > 1 else 1
        inner_blocks = pl.cdiv(total_blocks, ncores)
        last_block = total_blocks - 1
        last_block_rows = rows - last_block * tile_rows

        def in_map(c, i):
            # Clamp so the DMA never targets a block starting past the array;
            # the in-kernel `nominal <= last_block` gate skips re-read data.
            return (jnp.minimum(c * inner_blocks + i, last_block), 0)

        kernel = functools.partial(
            _focal_loss_kernel,
            gamma=gamma, alpha=alpha,
            inner_blocks=inner_blocks, last_block=last_block,
            last_block_rows=last_block_rows,
            chunk_rows=chunk_rows, num_chunks=num_chunks)

        partials = pl.pallas_call(
            kernel,
            out_shape=jax.ShapeDtypeStruct((ncores, 1), jnp.float32),
            grid_spec=pltpu.PrefetchScalarGridSpec(
                num_scalar_prefetch=0,
                grid=(ncores, inner_blocks),
                in_specs=[pl.BlockSpec((tile_rows, LANES), in_map),
                          pl.BlockSpec((tile_rows, LANES), in_map)],
                out_specs=pl.BlockSpec((1, 1), lambda c, i: (c, 0),
                                       memory_space=pltpu.SMEM),
                scratch_shapes=[pltpu.VMEM((8, LANES), jnp.float32)],
            ),
            compiler_params=pltpu.CompilerParams(
                dimension_semantics=("parallel", "arbitrary"),
                vmem_limit_bytes=32 * 1024 * 1024,
            ),
        )(p2d, t2d)
        total = total + jnp.sum(partials)

    if rem:
        total = total + _tail_loss_sum(p_flat[n_main:], t_flat[n_main:],
                                       gamma, alpha)

    if reduction == "mean":
        return total / jnp.float32(n_valid)
    return total


def _ref_bce_focal_loss(predict, target, gamma=1.0, alpha=0.75):
    x = predict.astype(jnp.float32)
    t = target.astype(jnp.float32)
    pt = jax.nn.sigmoid(x)
    loss = (-alpha * (1.0 - pt) ** gamma * t * jax.nn.log_sigmoid(x)
            - (1.0 - alpha) * pt ** gamma * (1.0 - t) * jax.nn.log_sigmoid(-x))
    return jnp.mean(loss)


if __name__ == "__main__":
    key = jax.random.PRNGKey(0)
    k1, k2 = jax.random.split(key)

    # NCHW-shaped logits and binary targets, small shapes.
    predict = jax.random.normal(k1, (2, 4, 16, 16), dtype=jnp.float32)
    target = (jax.random.uniform(k2, (2, 4, 16, 16)) > 0.5).astype(jnp.float32)

    out = bce_focal_loss(predict, target, gamma=1.0, alpha=0.75, reduction="mean")
    out = jax.block_until_ready(out)

    ref = _ref_bce_focal_loss(predict, target)
    assert jnp.allclose(out, ref, rtol=1e-5, atol=1e-6), (out, ref)

    print("KERNEL_OK")
</pallas_src>

<mosaic_0001>
module attributes {stable_mosaic.version = 11 : i64} {
  func.func @_focal_loss_kernel(%arg0: i32, %arg1: i32, %arg2: memref<32x128xf32, #tpu.memory_space<vmem>>, %arg3: memref<32x128xf32, #tpu.memory_space<vmem>>, %arg4: memref<1x1xf32, #tpu.memory_space<smem>>, %arg5: memref<8x128xf32, #tpu.memory_space<vmem>>) attributes {dimension_semantics = [#tpu.dimension_semantics<parallel>, #tpu.dimension_semantics<arbitrary>], iteration_bounds = array<i64: 1, 1>, scalar_prefetch = 0 : i64, scratch_operands = 1 : i64, tpu.core_type = #tpu.core_type<tc>, window_params = [{transform_indices = @transform_0, window_bounds = array<i64: 32, 128>}, {transform_indices = @transform_1, window_bounds = array<i64: 32, 128>}, {transform_indices = @transform_2, window_bounds = array<i64: 1, 1>}]} {
    %c1_i32 = arith.constant 1 : i32
    %0 = arith.muli %arg0, %c1_i32 : i32
    %1 = arith.addi %0, %arg1 : i32
    %c0_i32 = arith.constant 0 : i32
    %2 = arith.cmpi eq, %arg1, %c0_i32 : i32
    %3 = arith.extui %2 : i1 to i32
    %c0_i32_0 = arith.constant 0 : i32
    %4 = arith.cmpi ne, %3, %c0_i32_0 : i32
    scf.if %4 {
      %cst = arith.constant 0.000000e+00 : f32
      %14 = vector.broadcast %cst : f32 to vector<8x128xf32>
      %c0 = arith.constant 0 : index
      %c0_7 = arith.constant 0 : index
      %15 = vector.load %arg5[%c0, %c0_7] : memref<8x128xf32, #tpu.memory_space<vmem>>, vector<8x128xf32>
      tpu.vector_store %arg5[%c0, %c0_7], %14 {strides = array<i32>} : memref<8x128xf32, #tpu.memory_space<vmem>>, vector<8x128xf32>,
    } else {
    }
    %c0_i32_1 = arith.constant 0 : i32
    %5 = arith.cmpi slt, %1, %c0_i32_1 : i32
    %6 = arith.extui %5 : i1 to i32
    %c0_i32_2 = arith.constant 0 : i32
    %7 = arith.cmpi ne, %6, %c0_i32_2 : i32
    scf.if %7 {
      %cst = arith.constant 0.000000e+00 : f32
      %14 = vector.broadcast %cst : f32 to vector<8x128xf32>
      %c0_i32_7 = arith.constant 0 : i32
      %c32_i32 = arith.constant 32 : i32
      %15 = arith.muli %c0_i32_7, %c32_i32 : i32
      %16 = tpu.assume_multiple %15, 32 : i32
      %17 = arith.index_cast %16 : i32 to index
      %c0 = arith.constant 0 : index
      %18 = vector.load %arg2[%17, %c0] : memref<32x128xf32, #tpu.memory_space<vmem>>, vector<32x128xf32>
      %19 = arith.index_cast %16 : i32 to index
      %c0_8 = arith.constant 0 : index
      %20 = vector.load %arg3[%19, %c0_8] : memref<32x128xf32, #tpu.memory_space<vmem>>, vector<32x128xf32>
      %21 = math.absf %18 : vector<32x128xf32>
      %cst_9 = arith.constant 0.000000e+00 : f32
      %22 = vector.broadcast %cst_9 : f32 to vector<32x128xf32>
      %23 = arith.subf %22, %21 : vector<32x128xf32>
      %24 = math.exp %23 : vector<32x128xf32>
      %cst_10 = arith.constant 0.000000e+00 : f32
      %25 = vector.broadcast %cst_10 : f32 to vector<32x128xf32>
      %26 = arith.minimumf %18, %25 : vector<32x128xf32>
      %27 = math.log1p %24 : vector<32x128xf32>
      %28 = arith.subf %26, %27 : vector<32x128xf32>
      %29 = arith.subf %28, %18 : vector<32x128xf32>
      %cst_11 = arith.constant 1.000000e+00 : f32
      %30 = vector.broadcast %cst_11 : f32 to vector<32x128xf32>
      %31 = arith.addf %30, %24 : vector<32x128xf32>
      %32 = tpu.reciprocal %31 : vector<32x128xf32> -> vector<32x128xf32>
      %cst_12 = arith.constant 0.000000e+00 : f32
      %33 = vector.broadcast %cst_12 : f32 to vector<32x128xf32>
      %34 = arith.cmpf oge, %18, %33 : vector<32x128xf32>
      %35 = arith.mulf %24, %32 : vector<32x128xf32>
      %36 = arith.select %34, %32, %35 : vector<32x128xi1>, vector<32x128xf32>
      %37 = arith.mulf %24, %32 : vector<32x128xf32>
      %38 = arith.select %34, %37, %32 : vector<32x128xi1>, vector<32x128xf32>
      %cst_13 = arith.constant -7.500000e-01 : f32
      %39 = vector.broadcast %cst_13 : f32 to vector<32x128xf32>
      %40 = arith.mulf %39, %38 : vector<32x128xf32>
      %41 = arith.mulf %40, %20 : vector<32x128xf32>
      %42 = arith.mulf %41, %28 : vector<32x128xf32>
      %cst_14 = arith.constant 2.500000e-01 : f32
      %43 = vector.broadcast %cst_14 : f32 to vector<32x128xf32>
      %44 = arith.mulf %43, %36 : vector<32x128xf32>
      %cst_15 = arith.constant 1.000000e+00 : f32
      %45 = vector.broadcast %cst_15 : f32 to vector<32x128xf32>
      %46 = arith.subf %45, %20 : vector<32x128xf32>
      %47 = arith.mulf %44, %46 : vector<32x128xf32>
      %48 = arith.mulf %47, %29 : vector<32x128xf32>
      %49 = arith.subf %42, %48 : vector<32x128xf32>
      %50 = vector.shape_cast %49 : vector<32x128xf32> to vector<4x8x128xf32>
      %cst_16 = arith.constant dense<0.000000e+00> : vector<8x128xf32>
      %51 = vector.multi_reduction <add>, %50, %cst_16 [0] : vector<4x8x128xf32> to vector<8x128xf32>
      %52 = arith.addf %14, %51 : vector<8x128xf32>
      %c1_i32_17 = arith.constant 1 : i32
      %c0_18 = arith.constant 0 : index
      %c0_19 = arith.constant 0 : index
      %53 = vector.load %arg5[%c0_18, %c0_19] : memref<8x128xf32, #tpu.memory_space<vmem>>, vector<8x128xf32>
      %54 = arith.addf %53, %52 : vector<8x128xf32>
      %c0_20 = arith.constant 0 : index
      %c0_21 = arith.constant 0 : index
      %55 = vector.load %arg5[%c0_20, %c0_21] : memref<8x128xf32, #tpu.memory_space<vmem>>, vector<8x128xf32>
      tpu.vector_store %arg5[%c0_20, %c0_21], %54 {strides = array<i32>} : memref<8x128xf32, #tpu.memory_space<vmem>>, vector<8x128xf32>,
    } else {
    }
    %c0_i32_3 = arith.constant 0 : i32
    %8 = arith.cmpi eq, %1, %c0_i32_3 : i32
    %9 = arith.extui %8 : i1 to i32
    %c0_i32_4 = arith.constant 0 : i32
    %10 = arith.cmpi ne, %9, %c0_i32_4 : i32
    scf.if %10 {
      %cst = arith.constant 0.000000e+00 : f32
      %14 = vector.broadcast %cst : f32 to vector<8x128xf32>
      %c0_i32_7 = arith.constant 0 : i32
      %c32_i32 = arith.constant 32 : i32
      %15 = arith.muli %c0_i32_7, %c32_i32 : i32
      %16 = tpu.assume_multiple %15, 32 : i32
      %17 = arith.index_cast %16 : i32 to index
      %c0 = arith.constant 0 : index
      %18 = vector.load %arg2[%17, %c0] : memref<32x128xf32, #tpu.memory_space<vmem>>, vector<32x128xf32>
      %19 = arith.index_cast %16 : i32 to index
      %c0_8 = arith.constant 0 : index
      %20 = vector.load %arg3[%19, %c0_8] : memref<32x128xf32, #tpu.memory_space<vmem>>, vector<32x128xf32>
      %21 = math.absf %18 : vector<32x128xf32>
      %cst_9 = arith.constant 0.000000e+00 : f32
      %22 = vector.broadcast %cst_9 : f32 to vector<32x128xf32>
      %23 = arith.subf %22, %21 : vector<32x128xf32>
      %24 = math.exp %23 : vector<32x128xf32>
      %cst_10 = arith.constant 0.000000e+00 : f32
      %25 = vector.broadcast %cst_10 : f32 to vector<32x128xf32>
      %26 = arith.minimumf %18, %25 : vector<32x128xf32>
      %27 = math.log1p %24 : vector<32x128xf32>
      %28 = arith.subf %26, %27 : vector<32x128xf32>
      %29 = arith.subf %28, %18 : vector<32x128xf32>
      %cst_11 = arith.constant 1.000000e+00 : f32
      %30 = vector.broadcast %cst_11 : f32 to vector<32x128xf32>
      %31 = arith.addf %30, %24 : vector<32x128xf32>
      %32 = tpu.reciprocal %31 : vector<32x128xf32> -> vector<32x128xf32>
      %cst_12 = arith.constant 0.000000e+00 : f32
      %33 = vector.broadcast %cst_12 : f32 to vector<32x128xf32>
      %34 = arith.cmpf oge, %18, %33 : vector<32x128xf32>
      %35 = arith.mulf %24, %32 : vector<32x128xf32>
      %36 = arith.select %34, %32, %35 : vector<32x128xi1>, vector<32x128xf32>
      %37 = arith.mulf %24, %32 : vector<32x128xf32>
      %38 = arith.select %34, %37, %32 : vector<32x128xi1>, vector<32x128xf32>
      %cst_13 = arith.constant -7.500000e-01 : f32
      %39 = vector.broadcast %cst_13 : f32 to vector<32x128xf32>
      %40 = arith.mulf %39, %38 : vector<32x128xf32>
      %41 = arith.mulf %40, %20 : vector<32x128xf32>
      %42 = arith.mulf %41, %28 : vector<32x128xf32>
      %cst_14 = arith.constant 2.500000e-01 : f32
      %43 = vector.broadcast %cst_14 : f32 to vector<32x128xf32>
      %44 = arith.mulf %43, %36 : vector<32x128xf32>
      %cst_15 = arith.constant 1.000000e+00 : f32
      %45 = vector.broadcast %cst_15 : f32 to vector<32x128xf32>
      %46 = arith.subf %45, %20 : vector<32x128xf32>
      %47 = arith.mulf %44, %46 : vector<32x128xf32>
      %48 = arith.mulf %47, %29 : vector<32x128xf32>
      %49 = arith.subf %42, %48 : vector<32x128xf32>
      %50 = tpu.iota {dimensions = array<i32: 0>} : vector<32x128xi32>
      %51 = vector.broadcast %16 : i32 to vector<32x128xi32>
      %52 = arith.addi %51, %50 : vector<32x128xi32>
      %c16_i32 = arith.constant 16 : i32
      %53 = vector.broadcast %c16_i32 : i32 to vector<32x128xi32>
      %54 = arith.cmpi slt, %52, %53 : vector<32x128xi32>
      %cst_16 = arith.constant 0.000000e+00 : f32
      %55 = vector.broadcast %cst_16 : f32 to vector<32x128xf32>
      %56 = arith.select %54, %49, %55 : vector<32x128xi1>, vector<32x128xf32>
      %57 = vector.shape_cast %56 : vector<32x128xf32> to vector<4x8x128xf32>
      %cst_17 = arith.constant dense<0.000000e+00> : vector<8x128xf32>
      %58 = vector.multi_reduction <add>, %57, %cst_17 [0] : vector<4x8x128xf32> to vector<8x128xf32>
      %59 = arith.addf %14, %58 : vector<8x128xf32>
      %c1_i32_18 = arith.constant 1 : i32
      %c0_19 = arith.constant 0 : index
      %c0_20 = arith.constant 0 : index
      %60 = vector.load %arg5[%c0_19, %c0_20] : memref<8x128xf32, #tpu.memory_space<vmem>>, vector<8x128xf32>
      %61 = arith.addf %60, %59 : vector<8x128xf32>
      %c0_21 = arith.constant 0 : index
      %c0_22 = arith.constant 0 : index
      %62 = vector.load %arg5[%c0_21, %c0_22] : memref<8x128xf32, #tpu.memory_space<vmem>>, vector<8x128xf32>
      tpu.vector_store %arg5[%c0_21, %c0_22], %61 {strides = array<i32>} : memref<8x128xf32, #tpu.memory_space<vmem>>, vector<8x128xf32>,
    } else {
    }
    %c0_i32_5 = arith.constant 0 : i32
    %11 = arith.cmpi eq, %arg1, %c0_i32_5 : i32
    %12 = arith.extui %11 : i1 to i32
    %c0_i32_6 = arith.constant 0 : i32
    %13 = arith.cmpi ne, %12, %c0_i32_6 : i32
    scf.if %13 {
      %c0 = arith.constant 0 : index
      %c0_7 = arith.constant 0 : index
      %14 = vector.load %arg5[%c0, %c0_7] : memref<8x128xf32, #tpu.memory_space<vmem>>, vector<8x128xf32>
      %15 = vector.shape_cast %14 : vector<8x128xf32> to vector<1x8x128xf32>
      %cst = arith.constant dense<0.000000e+00> : vector<1xf32>
      %16 = vector.multi_reduction <add>, %15, %cst [1, 2] : vector<1x8x128xf32> to vector<1xf32>
      %17 = vector.shape_cast %16 : vector<1xf32> to vector<1x1x1xf32>
      %18 = vector.extract %17[0, 0, 0] : f32 from vector<1x1x1xf32>
      %c0_8 = arith.constant 0 : index
      %c0_9 = arith.constant 0 : index
      %19 = memref.load %arg4[%c0_8, %c0_9] : memref<1x1xf32, #tpu.memory_space<smem>>
      memref.store %18, %arg4[%c0_8, %c0_9] : memref<1x1xf32, #tpu.memory_space<smem>>
    } else {
    }
    return
  }
  func.func @transform_0(%arg0: i32, %arg1: i32) -> (i32, i32) {
    %c1_i32 = arith.constant 1 : i32
    %0 = arith.muli %arg0, %c1_i32 : i32
    %1 = arith.addi %0, %arg1 : i32
    %c0_i32 = arith.constant 0 : i32
    %2 = arith.minsi %1, %c0_i32 : i32
    %c0_i32_0 = arith.constant 0 : i32
    %c0_i32_1 = arith.constant 0 : i32
    return %2, %c0_i32_0 : i32, i32
  }
  func.func @transform_1(%arg0: i32, %arg1: i32) -> (i32, i32) {
    %c1_i32 = arith.constant 1 : i32
    %0 = arith.muli %arg0, %c1_i32 : i32
    %1 = arith.addi %0, %arg1 : i32
    %c0_i32 = arith.constant 0 : i32
    %2 = arith.minsi %1, %c0_i32 : i32
    %c0_i32_0 = arith.constant 0 : i32
    %c0_i32_1 = arith.constant 0 : i32
    return %2, %c0_i32_0 : i32, i32
  }
  func.func @transform_2(%arg0: i32, %arg1: i32) -> (i32, i32) {
    %c0_i32 = arith.constant 0 : i32
    %c0_i32_0 = arith.constant 0 : i32
    return %arg0, %c0_i32 : i32, i32
  }
}

</mosaic_0001>

<bundles_post_ra>
// kernel: tpu_custom_call.1
= control target key start
LH: loop header
LB: loop body
LE: loop exit
PB: predicated region body
PF: predicated region fallthrough
CT: control target
= control target key end

     0   :  { %7 = vsyncpa [#allocation4], 0  ;;  %s666_s0 = inlined_call_operand.hbm [shape: f32[16,128], index: 0, kind: input, shape index: {}]   ;;  %s667_s1 = inlined_call_operand.hbm [shape: f32[16,128], index: 1, kind: input, shape index: {}]   ;;  %s668_s2 = inlined_call_operand.hbm [shape: f32[1,1], index: 2, kind: output, shape index: {}]  }
   0x1   :  { %8 = vsyncpa [#allocation7], 0 }
   0x2   :  { %9 = vsyncpa [#allocation5], 0 }
   0x3   :  { %20 = vsyncadd [#allocation4], 256  ;;  %s25_s11 = sshll.u32 %s666_s0, 4  ;;  %s605_s12 = smov [#allocation3]   ;;  %s26_s11 = int_to_ptr.hbm [resolvable:$true] %s25_s11 }
   0x4   :  { %s27_s13 = sshll.u32 %s605_s12, 4  ;;  %s606_s14 = smov 128   ;;  %s28_s13 = int_to_ptr.vmem [resolvable:$true] %s27_s13 }
   0x5   :  { %s607_s15 = smov 8  }
   0x6   :  { %33 = dma.hbm_to_vmem [thread:$0]  %s26_s11, 256, %s28_s13, [#allocation4], %s606_s14, %s606_s14, %s607_s15  }
   0x7   :  { %44 = vsyncadd [#allocation7], 256  ;;  %s49_s18 = sshll.u32 %s667_s1, 4  ;;  %s608_s19 = smov [#allocation6]   ;;  %s50_s18 = int_to_ptr.hbm [resolvable:$true] %s49_s18 }
   0x8   :  { %s51_s20 = sshll.u32 %s608_s19, 4  ;;  %s52_s20 = int_to_ptr.vmem [resolvable:$true] %s51_s20 }
   0x9   :  { %57 = dma.hbm_to_vmem [thread:$0]  %s50_s18, 256, %s52_s20, [#allocation7], %s606_s14, %s606_s14, %s607_s15  }
   0xa   :  { %599 = dma.done.wait [#allocation4], 512  }
   0xb   :  { %600 = vsyncadd [#allocation4], 4294966784 }
   0xc   :  { %601 = dma.done.wait [#allocation7], 512  }
   0xd   :  { %602 = vsyncadd [#allocation7], 4294966784  ;;  %v631_v0 = vld [vmem:[#allocation3] sm:$0xff]  ;;  %v633_v1 = vld [vmem:[#allocation3 + $0x8] sm:$0xff]  ;;  %s504_s21 = sshll.u32 %s668_s2, 4  ;;  %s609_s23 = smov [#allocation8]   ;;  %s505_s21 = int_to_ptr.hbm [resolvable:$true] %s504_s21 }
   0xe   :  { %v287_v2 = vand.u32 2147483647, %v631_v0  ;;  %v288_v3 = vand.u32 2147483647, %v633_v1  ;;  %v303_v35 = vmin.f32 %v631_v0, 0.0  ;;  %v304_v42 = vmin.f32 %v633_v1, 0.0 }
   0xf   :  { %v283_v47 = vld [vmem:[#allocation6] sm:$0xff]  ;;  %v284_v50 = vld [vmem:[#allocation6 + $0x8] sm:$0xff]  ;;  %vm411_vm10 = vcmp.ge.f32.partialorder %v631_v0, 0.0  ;;  %vm412_vm11 = vcmp.ge.f32.partialorder %v633_v1, 0.0 }
  0x10   :  { %v291_v4 = vsub.f32 0.0, %v287_v2  ;;  %v292_v5 = vsub.f32 0.0, %v288_v3  ;;  %v443_v57 = vsub.f32 1.0, %v283_v47  ;;  %v444_v61 = vsub.f32 1.0, %v284_v50 }
  0x12   :  { %v295_v6 = vmul.f32 1.442695, %v291_v4  ;;  %v297_v7 = vmul.f32 1.442695, %v292_v5 }
  0x14   :  { %527 = vpow2.f32 %v295_v6 }
  0x15   :  { %529 = vpow2.f32 %v297_v7 }
  0x1a   :  { %v528_v8 = vpop.eup %527 }
  0x1b   :  { %v530_v9 = vpop.eup %529  ;;  %v307_v10 = vadd.f32 1.0, %v528_v8  ;;  %v310_v12 = vmul.f32 -0.5, %v528_v8  ;;  %v313_v14 = vand.u32 2147483647, %v528_v8 }
  0x1c   :  { %v316_v11 = vadd.f32 1.0, %v530_v9  ;;  %v319_v13 = vmul.f32 -0.5, %v530_v9  ;;  %v322_v21 = vand.u32 2147483647, %v530_v9 }
  0x1d   :  { %531 = vlog2.f32 %v307_v10  ;;  %v311_v15 = vadd.f32 1.0, %v310_v12  ;;  %vm637_vm0 = vcmp.lt.f32.partialorder %v313_v14, 0.0004427343  ;;  %vm360_vm1 = vweird.f32 %v307_v10 }
  0x1e   :  { %533 = vlog2.f32 %v316_v11  ;;  %v320_v18 = vadd.f32 1.0, %v319_v13  ;;  %v364_v25 = vand.u32 2147483647, %v307_v10  ;;  %v366_v27 = vand.u32 2147483648, %v307_v10 }
  0x1f   :  { %535 = vrcp.f32 %v307_v10  ;;  %v312_v23 = vmul.f32 %v528_v8, %v311_v15  ;;  %vm374_vm2 = vweird.f32 %v316_v11  ;;  %v380_v31 = vand.u32 2147483648, %v316_v11 }
  0x20   :  { %537 = vrcp.f32 %v316_v11  ;;  %v321_v29 = vmul.f32 %v530_v9, %v320_v18  ;;  %v378_v34 = vand.u32 2147483647, %v316_v11  ;;  %vm642_vm5 = vcmp.lt.f32.partialorder %v322_v21, 0.0004427343 }
  0x21   :  { %v367_v40 = vor.u32 1.1754944e-38, %v366_v27  ;;  %vm365_vm7 = vcmp.eq.f32.partialorder %v364_v25, 8.507059e+37  ;;  %v381_v44 = vor.u32 1.1754944e-38, %v380_v31 }
  0x22   :  { %vm379_vm9 = vcmp.eq.f32.partialorder %v378_v34, 8.507059e+37 }
  0x23   :  { %v532_v16 = vpop.eup %531 }
  0x24   :  { %v534_v17 = vpop.eup %533  ;;  %v309_v26 = vmul.f32 0.6931472, %v532_v16 }
  0x25   :  { %v536_v19 = vpop.eup %535  ;;  %v318_v32 = vmul.f32 0.6931472, %v534_v17 }
  0x26   :  { %v538_v22 = vpop.eup %537  ;;  %v356_v24 = vmul.f32 %v536_v19, %v307_v10  ;;  %vm361_vm3 = vweird.f32 %v536_v19  ;;  %v315_v38 = vsel %vm637_vm0, %v312_v23, %v309_v26 }
  0x27   :  { %v370_v28 = vmul.f32 %v538_v22, %v316_v11  ;;  %vm375_vm4 = vweird.f32 %v538_v22  ;;  %vm649_vm6 = vmor %vm360_vm1, %vm361_vm3  ;;  %v324_v45 = vsel %vm642_vm5, %v321_v29, %v318_v32  ;;  %v343_v48 = vsub.f32 %v303_v35, %v315_v38 }
  0x28   :  { %v357_v30 = vsub.f32 1.0, %v356_v24  ;;  %vm376_vm8 = vmor %vm374_vm2, %vm375_vm4  ;;  %v344_v53 = vsub.f32 %v304_v42, %v324_v45 }
  0x29   :  { %v371_v33 = vsub.f32 1.0, %v370_v28  ;;  %v347_v58 = vsub.f32 %v343_v48, %v631_v0 }
  0x2a   :  { %v358_v37 = vmul.f32 %v536_v19, %v357_v30  ;;  %v348_v4 = vsub.f32 %v344_v53, %v633_v1 }
  0x2b   :  { %v372_v41 = vmul.f32 %v538_v22, %v371_v33 }
  0x2c   :  { %v359_v43 = vadd.f32 %v536_v19, %v358_v37 }
  0x2d   :  { %v373_v46 = vadd.f32 %v538_v22, %v372_v41 }
  0x2e   :  { %v363_v49 = vsel %vm649_vm6, %v536_v19, %v359_v43 }
  0x2f   :  { %v368_v51 = vsel %vm365_vm7, %v367_v40, %v363_v49  ;;  %v377_v52 = vsel %vm376_vm8, %v538_v22, %v373_v46 }
  0x30   :  { %v382_v54 = vsel %vm379_vm9, %v381_v44, %v377_v52  ;;  %v415_v55 = vmul.f32 %v528_v8, %v368_v51 }
  0x31   :  { %v416_v56 = vmul.f32 %v530_v9, %v382_v54 }
  0x32   :  { %v419_v59 = vsel %vm411_vm10, %v368_v51, %v415_v55  ;;  %v423_v60 = vsel %vm411_vm10, %v415_v55, %v368_v51 }
  0x33   :  { %v420_v62 = vsel %vm412_vm11, %v382_v54, %v416_v56  ;;  %v424_v63 = vsel %vm412_vm11, %v416_v56, %v382_v54  ;;  %v427_v2 = vmul.f32 -0.75, %v423_v60  ;;  %v439_v3 = vmul.f32 0.25, %v419_v59 }
  0x34   :  { %v428_v5 = vmul.f32 -0.75, %v424_v63  ;;  %v440_v6 = vmul.f32 0.25, %v420_v62 }
  0x35   :  { %v431_v7 = vmul.f32 %v427_v2, %v283_v47  ;;  %v447_v10 = vmul.f32 %v443_v57, %v439_v3 }
  0x36   :  { %v432_v11 = vmul.f32 %v428_v5, %v284_v50  ;;  %v448_v12 = vmul.f32 %v444_v61, %v440_v6 }
  0x37   :  { %v435_v8 = vmul.f32 %v431_v7, %v343_v48  ;;  %v451_v9 = vmul.f32 %v447_v10, %v347_v58 }
  0x38   :  { %v436_v13 = vmul.f32 %v432_v11, %v344_v53  ;;  %v452_v14 = vmul.f32 %v448_v12, %v348_v4 }
  0x39   :  { %v455_v0 = vsub.f32 %v435_v8, %v451_v9 }
  0x3a   :  { %v456_v15 = vsub.f32 %v436_v13, %v452_v14 }
  0x3c   :  { %v477_v16 = vadd.f32 %v456_v15, %v455_v0 }
  0x3e   :  { %488 = vadd.xlane.f32.xlu0 %v477_v16 }
  0xb1   :  { %v489_v17 = vpop.xlane.xlu0 %488 }
  0xb2   :  { %v490_v18 = vrot.slane %v489_v17, 4 }
  0xb4   :  { %v491_v19 = vadd.f32 %v490_v18, %v489_v17 }
  0xb6   :  { %v492_v20 = vrot.slane %v491_v19, 2 }
  0xb8   :  { %v493_v21 = vadd.f32 %v492_v20, %v491_v19 }
  0xba   :  { %v494_v1 = vrot.slane %v493_v21, 1 }
  0xbc   :  { %v495_v22 = vadd.f32 %v494_v1, %v493_v21 }
  0xbe   :  { %520 = vpush %v495_v22 }
  0xef   :  { %s521_s22 = spop %520 }
  0xf0   :  { %498 = sst [smem:[#allocation8]] %s521_s22 }
  0xf1   :  { %507 = dma.smem_to_hbm %s609_s23, 16, %s505_s21, [#allocation5]  }
  0xf2   :  { %603 = dma.done.wait [#allocation5], 16  }
  0xf3   :  { %604 = vsyncadd [#allocation5], 4294967280 }
  0xf4   :  { %512 = sfence }
  0xf5   :  { %513 = vsyncpa [#allocation4], 1 }
  0xf6   :  { %514 = vsyncpa [#allocation7], 1 }
  0xf7   :  { %515 = vsyncpa [#allocation5], 1 }

</bundles_post_ra>
